<compile_context>
chip_gen: v7x
topology: tpu7x:2x2x1
jax: 0.10.0
libtpu: 0.0.40
codegen_flags: <defaults>
</compile_context>

<pallas_src>
import jax
import jax.numpy as jnp
from jax.experimental import pallas as pl
from jax.experimental.pallas import tpu as pltpu

INPUT_DIM = 512
OUTPUT_DIM = 512  # EMBEDDING_DIM
BN_EPS = 1e-5


def _dimred_kernel(x_ref, w_ref, p_ref, o_ref):
    # x_ref: (B, K)   input, native dtype (bf16 by default) -- single block
    # w_ref: (K, TN)  weight tile, (in, out) layout, same dtype as x
    # p_ref: (2, TN)  f32 fused BN params: row 0 = gamma, row 1 = beta
    # o_ref: (B, TN)  f32 output tile (lane-dense, unmasked vst)

    # Native-dtype MXU matmul, f32 accumulation.  Linear bias omitted: it is
    # cancelled exactly by the training-mode BN mean subtraction below.
    y = jnp.dot(x_ref[...], w_ref[...], preferred_element_type=jnp.float32)

    # BatchNorm1d, training-mode statistics (per-feature mean, biased var).
    mean = jnp.mean(y, axis=0, keepdims=True)                # (1, TN)
    diff = y - mean
    var = jnp.mean(diff * diff, axis=0, keepdims=True)       # biased var
    scale = jax.lax.rsqrt(var + BN_EPS) * p_ref[0:1, :]      # inv_std * gamma
    o_ref[...] = (diff * scale + p_ref[1:2, :]).astype(o_ref.dtype)


def dimension_reduction(x, w_t, gamma, beta, *, n_tiles=1):
    """Linear + BatchNorm1d (training stats) fused forward.

    x:   (B, ...) -- flattened to (B, input_dim) inside, cast to w_t.dtype.
    w_t: (input_dim, output_dim) weight, already transposed (in, out).
         Pass bf16 for the halved-DMA fast path (default in __main__).
    gamma/beta: (output_dim,) BN affine params (f32).

    n_tiles=1 (default, all generations).  n_tiles>1 splits the N axis
    across grid steps -- only enable after measuring; on v7x both cores
    share HBM so it is expected neutral-to-negative.
    """
    B = x.shape[0]
    x2 = x.reshape(B, -1)                       # x.view(x.size(0), -1)
    K = x2.shape[1]
    N = w_t.shape[1]
    assert K == w_t.shape[0]
    assert N % n_tiles == 0
    tile_n = N // n_tiles
    assert tile_n % 128 == 0

    # Match x dtype to the weight so the MXU gets a homogeneous-dtype matmul
    # (bf16 x bf16 -> f32 acc) with no in-kernel upcast copies.
    if x2.dtype != w_t.dtype:
        x2 = x2.astype(w_t.dtype)

    # Fused BN params: (2, N) f32, row 0 = gamma, row 1 = beta.
    params = jnp.stack(
        [gamma.reshape(N).astype(jnp.float32),
         beta.reshape(N).astype(jnp.float32)], axis=0)

    itemsize_in = jnp.dtype(w_t.dtype).itemsize
    bytes_accessed = (B * K * itemsize_in          # x
                      + K * N * itemsize_in        # weight
                      + 2 * N * 4                  # gamma/beta
                      + B * N * 4)                 # f32 output
    cost = pl.CostEstimate(flops=2 * B * K * N + 8 * B * N,
                           transcendentals=N,       # rsqrt per feature
                           bytes_accessed=bytes_accessed)

    return pl.pallas_call(
        _dimred_kernel,
        out_shape=jax.ShapeDtypeStruct((B, N), jnp.float32),
        grid_spec=pltpu.PrefetchScalarGridSpec(
            num_scalar_prefetch=0,
            grid=(n_tiles,),
            in_specs=[
                pl.BlockSpec((B, K), lambda j: (0, 0)),        # x (resident)
                pl.BlockSpec((K, tile_n), lambda j: (0, j)),   # weight tile
                pl.BlockSpec((2, tile_n), lambda j: (0, j)),   # gamma/beta
            ],
            out_specs=pl.BlockSpec((B, tile_n), lambda j: (0, j)),
        ),
        compiler_params=pltpu.CompilerParams(
            dimension_semantics=("parallel",)),
        cost_estimate=cost,
    )(x2, w_t, params)


def _reference(x, w_t, b, gamma, beta):
    """Full PyTorch-module semantics (f32, bias included) in plain JAX."""
    x2 = x.reshape(x.shape[0], -1).astype(jnp.float32)
    y = x2 @ w_t.astype(jnp.float32) + b
    mean = jnp.mean(y, axis=0, keepdims=True)
    var = jnp.mean((y - mean) ** 2, axis=0, keepdims=True)
    y_hat = (y - mean) * jax.lax.rsqrt(var + BN_EPS)
    return y_hat * gamma + beta


if __name__ == "__main__":
    key = jax.random.PRNGKey(0)
    k_x, k_w, k_b = jax.random.split(key, 3)

    # (B, C, H, W) = (8, 2, 16, 16) -> flatten = 512 = input_dim of the module.
    B, C, H, W = 8, 2, 16, 16
    assert C * H * W == INPUT_DIM
    x = jax.random.normal(k_x, (B, C, H, W), dtype=jnp.float32)

    # PyTorch nn.Linear-like uniform init (f32 master copy).
    bound = 1.0 / (INPUT_DIM ** 0.5)
    w = jax.random.uniform(k_w, (OUTPUT_DIM, INPUT_DIM), jnp.float32,
                           minval=-bound, maxval=bound)   # PyTorch (out, in)
    b = jax.random.uniform(k_b, (OUTPUT_DIM,), jnp.float32,
                           minval=-bound, maxval=bound)
    w_t_f32 = w.T                                          # (in, out)
    gamma = jnp.ones((OUTPUT_DIM,), jnp.float32)           # BN affine defaults
    beta = jnp.zeros((OUTPUT_DIM,), jnp.float32)

    # bf16 weight in HBM -> halved weight DMA (the dominant cost).
    w_t_bf16 = w_t_f32.astype(jnp.bfloat16)

    out = dimension_reduction(x, w_t_bf16, gamma, beta)
    out = jax.block_until_ready(out)
    assert out.shape == (B, OUTPUT_DIM)
    assert out.dtype == jnp.float32

    # Check 1 (tight): against a reference using the same bf16-rounded
    # operands upcast to f32 -- validates the kernel math itself.
    ref_bf16 = _reference(x.astype(jnp.bfloat16).astype(jnp.float32),
                          w_t_bf16.astype(jnp.float32), b, gamma, beta)
    assert jnp.allclose(out, ref_bf16, atol=1e-3, rtol=1e-3)

    # Check 2 (loose): against the exact f32 module semantics -- bounds the
    # bf16 quantization error (f32 accumulation keeps it small).
    ref_f32 = _reference(x, w_t_f32, b, gamma, beta)
    assert jnp.allclose(out, ref_f32, atol=5e-2, rtol=5e-2)

    print("KERNEL_OK")
</pallas_src>

<mosaic_0001>
module attributes {stable_mosaic.version = 11 : i64} {
  func.func @_dimred_kernel(%arg0: i32, %arg1: memref<8x512xbf16, #tpu.memory_space<vmem>>, %arg2: memref<512x512xbf16, #tpu.memory_space<vmem>>, %arg3: memref<2x512xf32, #tpu.memory_space<vmem>>, %arg4: memref<8x512xf32, #tpu.memory_space<vmem>>) attributes {dimension_semantics = [#tpu.dimension_semantics<parallel>], iteration_bounds = array<i64: 1>, scalar_prefetch = 0 : i64, scratch_operands = 0 : i64, tpu.core_type = #tpu.core_type<tc>, window_params = [{pipeline_mode = #tpu.pipeline_mode<synchronous>, transform_indices = @transform_0, window_bounds = array<i64: 8, 512>}, {transform_indices = @transform_1, window_bounds = array<i64: 512, 512>}, {transform_indices = @transform_2, window_bounds = array<i64: 2, 512>}, {transform_indices = @transform_3, window_bounds = array<i64: 8, 512>}]} {
    %c0 = arith.constant 0 : index
    %c0_0 = arith.constant 0 : index
    %0 = vector.load %arg1[%c0, %c0_0] : memref<8x512xbf16, #tpu.memory_space<vmem>>, vector<8x512xbf16>
    %c0_1 = arith.constant 0 : index
    %c0_2 = arith.constant 0 : index
    %1 = vector.load %arg2[%c0_1, %c0_2] : memref<512x512xbf16, #tpu.memory_space<vmem>>, vector<512x512xbf16>
    %cst = arith.constant dense<0.000000e+00> : vector<8x512xf32>
    %2 = tpu.matmul %0, %1, %cst {dimension_numbers = #tpu.dot_dimension_numbers<[1], [0], [0], [1], [0, 0, 1, 1], [], []>} : vector<8x512xbf16>, vector<512x512xbf16>, vector<8x512xf32> -> vector<8x512xf32>
    %cst_3 = arith.constant dense<0.000000e+00> : vector<512xf32>
    %3 = vector.multi_reduction <add>, %2, %cst_3 [0] : vector<8x512xf32> to vector<512xf32>
    %4 = vector.shape_cast %3 : vector<512xf32> to vector<1x512xf32>
    %cst_4 = arith.constant 8.000000e+00 : f32
    %5 = vector.broadcast %cst_4 : f32 to vector<1x512xf32>
    %6 = arith.divf %4, %5 : vector<1x512xf32>
    %7 = vector.broadcast %6 : vector<1x512xf32> to vector<8x512xf32>
    %8 = arith.subf %2, %7 : vector<8x512xf32>
    %9 = arith.mulf %8, %8 : vector<8x512xf32>
    %cst_5 = arith.constant dense<0.000000e+00> : vector<512xf32>
    %10 = vector.multi_reduction <add>, %9, %cst_5 [0] : vector<8x512xf32> to vector<512xf32>
    %11 = vector.shape_cast %10 : vector<512xf32> to vector<1x512xf32>
    %cst_6 = arith.constant 8.000000e+00 : f32
    %12 = vector.broadcast %cst_6 : f32 to vector<1x512xf32>
    %13 = arith.divf %11, %12 : vector<1x512xf32>
    %cst_7 = arith.constant 9.99999974E-6 : f32
    %14 = vector.broadcast %cst_7 : f32 to vector<1x512xf32>
    %15 = arith.addf %13, %14 : vector<1x512xf32>
    %16 = math.rsqrt %15 : vector<1x512xf32>
    %c0_8 = arith.constant 0 : index
    %c0_9 = arith.constant 0 : index
    %17 = vector.load %arg3[%c0_8, %c0_9] : memref<2x512xf32, #tpu.memory_space<vmem>>, vector<1x512xf32>
    %18 = arith.mulf %16, %17 : vector<1x512xf32>
    %19 = vector.broadcast %18 : vector<1x512xf32> to vector<8x512xf32>
    %20 = arith.mulf %8, %19 : vector<8x512xf32>
    %c1 = arith.constant 1 : index
    %c0_10 = arith.constant 0 : index
    %21 = vector.load %arg3[%c1, %c0_10] : memref<2x512xf32, #tpu.memory_space<vmem>>, vector<1x512xf32>
    %22 = vector.broadcast %21 : vector<1x512xf32> to vector<8x512xf32>
    %23 = arith.addf %20, %22 : vector<8x512xf32>
    %c0_11 = arith.constant 0 : index
    %c0_12 = arith.constant 0 : index
    %24 = vector.load %arg4[%c0_11, %c0_12] : memref<8x512xf32, #tpu.memory_space<vmem>>, vector<8x512xf32>
    tpu.vector_store %arg4[%c0_11, %c0_12], %23 {strides = array<i32>} : memref<8x512xf32, #tpu.memory_space<vmem>>, vector<8x512xf32>,
    return
  }
  func.func @transform_0(%arg0: i32) -> (i32, i32) {
    %c0_i32 = arith.constant 0 : i32
    %c0_i32_0 = arith.constant 0 : i32
    %c0_i32_1 = arith.constant 0 : i32
    return %c0_i32, %c0_i32_0 : i32, i32
  }
  func.func @transform_1(%arg0: i32) -> (i32, i32) {
    %c0_i32 = arith.constant 0 : i32
    %c0_i32_0 = arith.constant 0 : i32
    return %c0_i32, %arg0 : i32, i32
  }
  func.func @transform_2(%arg0: i32) -> (i32, i32) {
    %c0_i32 = arith.constant 0 : i32
    %c0_i32_0 = arith.constant 0 : i32
    return %c0_i32, %arg0 : i32, i32
  }
  func.func @transform_3(%arg0: i32) -> (i32, i32) {
    %c0_i32 = arith.constant 0 : i32
    %c0_i32_0 = arith.constant 0 : i32
    return %c0_i32, %arg0 : i32, i32
  }
}

</mosaic_0001>

<bundles_post_ra>
// kernel: tpu_custom_call.1
= control target key start
LH: loop header
LB: loop body
LE: loop exit
PB: predicated region body
PF: predicated region fallthrough
CT: control target
= control target key end

     0   :  { %8 = vsyncpa [#allocation3], 0  ;;  %s1710_s0 = inlined_call_operand.hbm [shape: bf16[8,512], index: 0, kind: input, shape index: {}]   ;;  %s1711_s1 = inlined_call_operand.hbm [shape: bf16[512,512], index: 1, kind: input, shape index: {}]   ;;  %s1712_s2 = inlined_call_operand.hbm [shape: f32[2,512], index: 2, kind: input, shape index: {}]   ;;  %s1713_s3 = inlined_call_operand.hbm [shape: f32[8,512], index: 3, kind: output, shape index: {}]  }
   0x1   :  { %9 = vsyncpa [#allocation6], 0 }
   0x2   :  { %10 = vsyncpa [#allocation4], 0  ;;  %s1610_s12 = smov [#allocation5]   ;;  %s1516_s16 = scalar_lea.hbm %s1711_s1, 16384 }
   0x3   :  { %s26_s13 = sshll.u32 %s1610_s12, 4  ;;  %p1517_p0 = scmp.ne.s32.totalorder %s1711_s1, %s1516_s16  ;;  %s27_s13 = int_to_ptr.vmem [resolvable:$true] %s26_s13 }
   0x4   :  { %p1520_p1 = scmp.lt.u32.totalorder %s1516_s16, %s1711_s1 }
   0x6   :  { %p1522_p2 = pnand %p1520_p1, %p1517_p0 }
   0x8   :  { %1525 = shalt.err (!%p1522_p2)
}
   0x9   :  { %s1526_s21 = scalar_lea.vmem %s27_s13, 16384  ;;  %p1531_p4 = scmp.lt.s32.totalorder %s27_s13, %s27_s13 }
   0xa   :  { %p1527_p3 = scmp.ne.s32.totalorder %s27_s13, %s1526_s21  ;;  %p1532_p5 = scmp.lt.s32.totalorder %s1526_s21, %s1526_s21 }
   0xc   :  { %p1533_p6 = por %p1532_p5, %p1531_p4 }
   0xe   :  { %p1534_p7 = pnand %p1533_p6, %p1527_p3 }
  0x10   :  { %1537 = shalt.err (!%p1534_p7)
}
  0x11   :  { %s1611_s22 = smov 256   ;;  %s1612_s23 = smov 16  }
  0x12   :  { %32 = dma.hbm_to_vmem [thread:$0]  %s1711_s1, 16384, %s27_s13, [#allocation6], %s1611_s22, %s1611_s22, %s1612_s23  }
  0x13   :  { %s1613_s26 = smov [#allocation2]   ;;  %s1614_s28 = smov [#allocation7]  }
  0x14   :  { %s17_s27 = sshll.u32 %s1613_s26, 4  ;;  %s39_s29 = sshll.u32 %s1614_s28, 4  ;;  %s18_s27 = int_to_ptr.vmem [resolvable:$true] %s17_s27  ;;  %s40_s29 = int_to_ptr.vmem [resolvable:$true] %s39_s29 }
  0x15   :  { %s1538_s5 = scalar_lea.hbm %s1710_s0, 256 }
  0x16   :  { %p1539_p8 = scmp.ne.s32.totalorder %s1710_s0, %s1538_s5  ;;  %p1542_p9 = scmp.lt.u32.totalorder %s1538_s5, %s1710_s0 }
  0x18   :  { %p1544_p10 = pnand %p1542_p9, %p1539_p8 }
  0x1a   :  { %1547 = shalt.err (!%p1544_p10)
}
  0x1b   :  { %s1548_s1 = scalar_lea.vmem %s18_s27, 256  ;;  %p1553_p12 = scmp.lt.s32.totalorder %s18_s27, %s18_s27 }
  0x1c   :  { %p1549_p11 = scmp.ne.s32.totalorder %s18_s27, %s1548_s1  ;;  %p1554_p13 = scmp.lt.s32.totalorder %s1548_s1, %s1548_s1 }
  0x1e   :  { %p1555_p0 = por %p1554_p13, %p1553_p12 }
  0x20   :  { %p1556_p1 = pnand %p1555_p0, %p1549_p11 }
  0x22   :  { %1559 = shalt.err (!%p1556_p1)
}
  0x23   :  { %20 = dma.hbm_to_vmem [thread:$0]  %s1710_s0, 256, %s18_s27, [#allocation3]  }
  0x24   :  { %s1560_s14 = scalar_lea.hbm %s1712_s2, 128 }
  0x25   :  { %p1561_p2 = scmp.ne.s32.totalorder %s1712_s2, %s1560_s14  ;;  %p1564_p3 = scmp.lt.u32.totalorder %s1560_s14, %s1712_s2 }
  0x27   :  { %p1566_p4 = pnand %p1564_p3, %p1561_p2 }
  0x29   :  { %1569 = shalt.err (!%p1566_p4)
}
  0x2a   :  { %s1570_s19 = scalar_lea.vmem %s40_s29, 128  ;;  %p1575_p6 = scmp.lt.s32.totalorder %s40_s29, %s40_s29 }
  0x2b   :  { %p1571_p5 = scmp.ne.s32.totalorder %s40_s29, %s1570_s19  ;;  %p1576_p7 = scmp.lt.s32.totalorder %s1570_s19, %s1570_s19 }
  0x2d   :  { %p1577_p8 = por %p1576_p7, %p1575_p6 }
  0x2f   :  { %p1578_p9 = pnand %p1577_p8, %p1571_p5 }
  0x31   :  { %1581 = shalt.err (!%p1578_p9)
}
  0x32   :  { %42 = dma.hbm_to_vmem [thread:$0]  %s1712_s2, 128, %s40_s29, [#allocation6]  }
  0x33   :  { %1604 = dma.done.wait [#allocation3], 256  }
  0x34   :  { %1605 = vsyncadd [#allocation3], 4294967040 }
  0x35   :  { %1606 = dma.done.wait [#allocation6], 16512  }
  0x36   :  { %1607 = vsyncadd [#allocation6], 4294950784  ;;  %v1312_v0 = vld [vmem:[#allocation5 + $0x4] ss:$16 sps:$4 sm:$0xff]   ;;  %v1314_v1 = vld [vmem:[#allocation5 + $0xc] ss:$16 sps:$4 sm:$0xff]  }
  0x37   :  { %836 = vmatprep.subr.bf16.mxu0 %v1312_v0  ;;  %v1316_v2 = vld [vmem:[#allocation5] ss:$16 sps:$4 sm:$0xff]   ;;  %v1317_v3 = vld [vmem:[#allocation5 + $0x8] ss:$16 sps:$4 sm:$0xff]   ;;  %918 = vmatprep.subr.bf16.mxu1 %v1314_v1  ;;  %v1318_v4 = vld [vmem:[#allocation5 + $0x24] ss:$16 sps:$4 sm:$0xff]  }
  0x38   :  { %837 = vmatpush1.bf16.msra.mxu0 %v1316_v2  ;;  %919 = vmatpush1.bf16.msra.mxu1 %v1317_v3  ;;  %v1320_v5 = vld [vmem:[#allocation5 + $0x2c] ss:$16 sps:$4 sm:$0xff]   ;;  %v1322_v6 = vld [vmem:[#allocation5 + $0x20] ss:$16 sps:$4 sm:$0xff]   ;;  %v1323_v7 = vld [vmem:[#allocation5 + $0x28] ss:$16 sps:$4 sm:$0xff]  }
  0x39   :  { %838 = vmatprep.subr.bf16.mxu0 %v1318_v4  ;;  %920 = vmatprep.subr.bf16.mxu1 %v1320_v5  ;;  %v1324_v8 = vld [vmem:[#allocation5 + $0x44] ss:$16 sps:$4 sm:$0xff]   ;;  %v1326_v9 = vld [vmem:[#allocation5 + $0x4c] ss:$16 sps:$4 sm:$0xff]   ;;  %v1328_v10 = vld [vmem:[#allocation5 + $0x40] ss:$16 sps:$4 sm:$0xff]  }
  0x3a   :  { %v1329_v11 = vld [vmem:[#allocation5 + $0x48] ss:$16 sps:$4 sm:$0xff]   ;;  %v1330_v12 = vld [vmem:[#allocation5 + $0x64] ss:$16 sps:$4 sm:$0xff]   ;;  %v1332_v13 = vld [vmem:[#allocation5 + $0x6c] ss:$16 sps:$4 sm:$0xff]  }
  0x3b   :  { %v1334_v14 = vld [vmem:[#allocation5 + $0x60] ss:$16 sps:$4 sm:$0xff]   ;;  %v1335_v15 = vld [vmem:[#allocation5 + $0x68] ss:$16 sps:$4 sm:$0xff]   ;;  %v1336_v16 = vld [vmem:[#allocation5 + $0x84] ss:$16 sps:$4 sm:$0xff]  }
  0x3c   :  { %839 = vmatpush1.bf16.msra.mxu0 %v1322_v6  ;;  %921 = vmatpush1.bf16.msra.mxu1 %v1323_v7  ;;  %v1338_v17 = vld [vmem:[#allocation5 + $0x8c] ss:$16 sps:$4 sm:$0xff]   ;;  %v1340_v18 = vld [vmem:[#allocation5 + $0x80] ss:$16 sps:$4 sm:$0xff]   ;;  %v1341_v19 = vld [vmem:[#allocation5 + $0x88] ss:$16 sps:$4 sm:$0xff]  }
  0x3d   :  { %840 = vmatprep.subr.bf16.mxu0 %v1324_v8  ;;  %922 = vmatprep.subr.bf16.mxu1 %v1326_v9  ;;  %v1342_v20 = vld [vmem:[#allocation5 + $0xa4] ss:$16 sps:$4 sm:$0xff]   ;;  %v1344_v21 = vld [vmem:[#allocation5 + $0xac] ss:$16 sps:$4 sm:$0xff]   ;;  %v1346_v22 = vld [vmem:[#allocation5 + $0xa0] ss:$16 sps:$4 sm:$0xff]  }
  0x3e   :  { %v1347_v23 = vld [vmem:[#allocation5 + $0xa8] ss:$16 sps:$4 sm:$0xff]   ;;  %v1348_v24 = vld [vmem:[#allocation5 + $0xc4] ss:$16 sps:$4 sm:$0xff]   ;;  %v1350_v25 = vld [vmem:[#allocation5 + $0xcc] ss:$16 sps:$4 sm:$0xff]  }
  0x3f   :  { %v1352_v26 = vld [vmem:[#allocation5 + $0xc0] ss:$16 sps:$4 sm:$0xff]   ;;  %v1353_v27 = vld [vmem:[#allocation5 + $0xc8] ss:$16 sps:$4 sm:$0xff]   ;;  %v1354_v28 = vld [vmem:[#allocation5 + $0xe4] ss:$16 sps:$4 sm:$0xff]  }
  0x40   :  { %841 = vmatpush1.bf16.msra.mxu0 %v1328_v10  ;;  %923 = vmatpush1.bf16.msra.mxu1 %v1329_v11  ;;  %v1356_v29 = vld [vmem:[#allocation5 + $0xec] ss:$16 sps:$4 sm:$0xff]   ;;  %v1358_v30 = vld [vmem:[#allocation5 + $0xe0] ss:$16 sps:$4 sm:$0xff]   ;;  %v1359_v31 = vld [vmem:[#allocation5 + $0xe8] ss:$16 sps:$4 sm:$0xff]  }
  0x41   :  { %842 = vmatprep.subr.bf16.mxu0 %v1330_v12  ;;  %924 = vmatprep.subr.bf16.mxu1 %v1332_v13  ;;  %v1360_v32 = vld [vmem:[#allocation5 + $0x104] ss:$16 sps:$4 sm:$0xff]   ;;  %v1362_v33 = vld [vmem:[#allocation5 + $0x10c] ss:$16 sps:$4 sm:$0xff]   ;;  %v1364_v34 = vld [vmem:[#allocation5 + $0x100] ss:$16 sps:$4 sm:$0xff]  }
  0x42   :  { %v1365_v35 = vld [vmem:[#allocation5 + $0x108] ss:$16 sps:$4 sm:$0xff]   ;;  %v1366_v36 = vld [vmem:[#allocation5 + $0x124] ss:$16 sps:$4 sm:$0xff]   ;;  %v1368_v37 = vld [vmem:[#allocation5 + $0x12c] ss:$16 sps:$4 sm:$0xff]  }
  0x43   :  { %v1370_v38 = vld [vmem:[#allocation5 + $0x120] ss:$16 sps:$4 sm:$0xff]   ;;  %v1371_v39 = vld [vmem:[#allocation5 + $0x128] ss:$16 sps:$4 sm:$0xff]   ;;  %v1372_v40 = vld [vmem:[#allocation5 + $0x144] ss:$16 sps:$4 sm:$0xff]  }
  0x44   :  { %843 = vmatpush1.bf16.msra.mxu0 %v1334_v14  ;;  %925 = vmatpush1.bf16.msra.mxu1 %v1335_v15  ;;  %v1374_v41 = vld [vmem:[#allocation5 + $0x14c] ss:$16 sps:$4 sm:$0xff]   ;;  %v1376_v42 = vld [vmem:[#allocation5 + $0x140] ss:$16 sps:$4 sm:$0xff]   ;;  %v1377_v43 = vld [vmem:[#allocation5 + $0x148] ss:$16 sps:$4 sm:$0xff]  }
  0x45   :  { %844 = vmatprep.subr.bf16.mxu0 %v1336_v16  ;;  %926 = vmatprep.subr.bf16.mxu1 %v1338_v17  ;;  %v1378_v44 = vld [vmem:[#allocation5 + $0x164] ss:$16 sps:$4 sm:$0xff]   ;;  %v1380_v45 = vld [vmem:[#allocation5 + $0x16c] ss:$16 sps:$4 sm:$0xff]   ;;  %v1382_v47 = vld [vmem:[#allocation5 + $0x160] ss:$16 sps:$4 sm:$0xff]  }
  0x46   :  { %v52_v46 = vld [vmem:[#allocation2] sm:$0xff]  ;;  %v1383_v49 = vld [vmem:[#allocation5 + $0x168] ss:$16 sps:$4 sm:$0xff]   ;;  %v1386_v51 = vld [vmem:[#allocation5 + $0x18c] ss:$16 sps:$4 sm:$0xff]   ;;  %s1615_s2 = smov [#allocation8]  }
  0x47   :  { %v1167_v48 = vcombine.high %v52_v46, %v52_v46  ;;  %v1384_v50 = vld [vmem:[#allocation5 + $0x184] ss:$16 sps:$4 sm:$0xff]   ;;  %v1388_v52 = vld [vmem:[#allocation5 + $0x180] ss:$16 sps:$4 sm:$0xff]   ;;  %v1389_v53 = vld [vmem:[#allocation5 + $0x188] ss:$16 sps:$4 sm:$0xff]   ;;  %v1166_v4 = vcombine.low %v52_v46, %v52_v46 }
  0x48   :  { %845 = vmatpush1.bf16.msra.mxu0 %v1340_v18  ;;  %927 = vmatpush1.bf16.msra.mxu1 %v1341_v19  ;;  %v1390_v54 = vld [vmem:[#allocation5 + $0x1a4] ss:$16 sps:$4 sm:$0xff]   ;;  %v1392_v55 = vld [vmem:[#allocation5 + $0x1ac] ss:$16 sps:$4 sm:$0xff]   ;;  %v1394_v56 = vld [vmem:[#allocation5 + $0x1a0] ss:$16 sps:$4 sm:$0xff]  }
  0x49   :  { %846 = vmatprep.subr.bf16.mxu0 %v1342_v20  ;;  %928 = vmatprep.subr.bf16.mxu1 %v1344_v21  ;;  %v1395_v57 = vld [vmem:[#allocation5 + $0x1a8] ss:$16 sps:$4 sm:$0xff]   ;;  %v1396_v58 = vld [vmem:[#allocation5 + $0x1c4] ss:$16 sps:$4 sm:$0xff]   ;;  %v1398_v59 = vld [vmem:[#allocation5 + $0x1cc] ss:$16 sps:$4 sm:$0xff]  }
  0x4a   :  { %868 = vmatprep.mubr.bf16.mxu0 %v1167_v48  ;;  %950 = vmatprep.mubr.bf16.mxu1 %v1167_v48  ;;  %v1400_v60 = vld [vmem:[#allocation5 + $0x1c0] ss:$16 sps:$4 sm:$0xff]   ;;  %v1401_v61 = vld [vmem:[#allocation5 + $0x1c8] ss:$16 sps:$4 sm:$0xff]   ;;  %v1402_v62 = vld [vmem:[#allocation5 + $0x1e4] ss:$16 sps:$4 sm:$0xff]  }
  0x4b   :  { %v1404_v63 = vld [vmem:[#allocation5 + $0x1ec] ss:$16 sps:$4 sm:$0xff]   ;;  %v1406_v0 = vld [vmem:[#allocation5 + $0x1e0] ss:$16 sps:$4 sm:$0xff]   ;;  %v1407_v1 = vld [vmem:[#allocation5 + $0x1e8] ss:$16 sps:$4 sm:$0xff]  }
  0x4c   :  { %847 = vmatpush1.bf16.msra.mxu0 %v1346_v22  ;;  %929 = vmatpush1.bf16.msra.mxu1 %v1347_v23  ;;  %v1412_v2 = vld [vmem:[#allocation5 + $0x204] ss:$16 sps:$4 sm:$0xff]   ;;  %v1415_v3 = vld [vmem:[#allocation5 + $0x20c] ss:$16 sps:$4 sm:$0xff]   ;;  %v1410_v5 = vld [vmem:[#allocation5 + $0x200] ss:$16 sps:$4 sm:$0xff]  }
  0x4d   :  { %848 = vmatprep.subr.bf16.mxu0 %v1348_v24  ;;  %930 = vmatprep.subr.bf16.mxu1 %v1350_v25  ;;  %v1413_v6 = vld [vmem:[#allocation5 + $0x208] ss:$16 sps:$4 sm:$0xff]   ;;  %v1418_v7 = vld [vmem:[#allocation5 + $0x224] ss:$16 sps:$4 sm:$0xff]   ;;  %v1421_v8 = vld [vmem:[#allocation5 + $0x22c] ss:$16 sps:$4 sm:$0xff]  }
  0x4e   :  { %v1416_v9 = vld [vmem:[#allocation5 + $0x220] ss:$16 sps:$4 sm:$0xff]   ;;  %v1419_v10 = vld [vmem:[#allocation5 + $0x228] ss:$16 sps:$4 sm:$0xff]   ;;  %v1424_v11 = vld [vmem:[#allocation5 + $0x244] ss:$16 sps:$4 sm:$0xff]  }
  0x4f   :  { %v1427_v12 = vld [vmem:[#allocation5 + $0x24c] ss:$16 sps:$4 sm:$0xff]   ;;  %v1422_v13 = vld [vmem:[#allocation5 + $0x240] ss:$16 sps:$4 sm:$0xff]   ;;  %v1425_v14 = vld [vmem:[#allocation5 + $0x248] ss:$16 sps:$4 sm:$0xff]  }
  0x50   :  { %849 = vmatpush1.bf16.msra.mxu0 %v1352_v26  ;;  %931 = vmatpush1.bf16.msra.mxu1 %v1353_v27  ;;  %v1430_v15 = vld [vmem:[#allocation5 + $0x264] ss:$16 sps:$4 sm:$0xff]   ;;  %v1433_v16 = vld [vmem:[#allocation5 + $0x26c] ss:$16 sps:$4 sm:$0xff]   ;;  %v1428_v17 = vld [vmem:[#allocation5 + $0x260] ss:$16 sps:$4 sm:$0xff]  }
  0x51   :  { %850 = vmatprep.subr.bf16.mxu0 %v1354_v28  ;;  %932 = vmatprep.subr.bf16.mxu1 %v1356_v29  ;;  %v1431_v18 = vld [vmem:[#allocation5 + $0x268] ss:$16 sps:$4 sm:$0xff]   ;;  %v1436_v19 = vld [vmem:[#allocation5 + $0x284] ss:$16 sps:$4 sm:$0xff]   ;;  %v1439_v20 = vld [vmem:[#allocation5 + $0x28c] ss:$16 sps:$4 sm:$0xff]  }
  0x52   :  { %v1434_v21 = vld [vmem:[#allocation5 + $0x280] ss:$16 sps:$4 sm:$0xff]   ;;  %v1437_v22 = vld [vmem:[#allocation5 + $0x288] ss:$16 sps:$4 sm:$0xff]   ;;  %v1442_v23 = vld [vmem:[#allocation5 + $0x2a4] ss:$16 sps:$4 sm:$0xff]  }
  0x53   :  { %v1445_v24 = vld [vmem:[#allocation5 + $0x2ac] ss:$16 sps:$4 sm:$0xff]   ;;  %v1440_v25 = vld [vmem:[#allocation5 + $0x2a0] ss:$16 sps:$4 sm:$0xff]   ;;  %v1443_v26 = vld [vmem:[#allocation5 + $0x2a8] ss:$16 sps:$4 sm:$0xff]  }
  0x54   :  { %851 = vmatpush1.bf16.msra.mxu0 %v1358_v30  ;;  %933 = vmatpush1.bf16.msra.mxu1 %v1359_v31  ;;  %v1448_v27 = vld [vmem:[#allocation5 + $0x2c4] ss:$16 sps:$4 sm:$0xff]   ;;  %v1451_v28 = vld [vmem:[#allocation5 + $0x2cc] ss:$16 sps:$4 sm:$0xff]   ;;  %v1446_v31 = vld [vmem:[#allocation5 + $0x2c0] ss:$16 sps:$4 sm:$0xff]  }
  0x55   :  { %852 = vmatprep.subr.bf16.mxu0 %v1360_v32  ;;  %934 = vmatprep.subr.bf16.mxu1 %v1362_v33  ;;  %v1672_v29 = vld [vmem:[#allocation2 + $0x8] sm:$0xff]  ;;  %v1454_v33 = vld [vmem:[#allocation5 + $0x2e4] ss:$16 sps:$4 sm:$0xff]   ;;  %s1156_s21 = sshll.u32 %s1615_s2, 4  ;;  %s1157_s21 = int_to_ptr.vmem [resolvable:$true] %s1156_s21 }
  0x56   :  { %v1169_v30 = vcombine.high %v1672_v29, %v1672_v29  ;;  %v1449_v32 = vld [vmem:[#allocation5 + $0x2c8] ss:$16 sps:$4 sm:$0xff]   ;;  %v1475_v46 = vld [vmem:[#allocation5 + $0x34c] ss:$16 sps:$4 sm:$0xff]   ;;  %s1582_s22 = scalar_lea.vmem %s1157_s21, 512  ;;  %p1587_p11 = scmp.lt.s32.totalorder %s1157_s21, %s1157_s21 }
  0x57   :  { %v1473_v48 = vld [vmem:[#allocation5 + $0x348] ss:$16 sps:$4 sm:$0xff]   ;;  %p1583_p10 = scmp.ne.s32.totalorder %s1157_s21, %s1582_s22  ;;  %p1588_p12 = scmp.lt.s32.totalorder %s1582_s22, %s1582_s22 }
  0x58   :  { %853 = vmatpush1.bf16.msra.mxu0 %v1364_v34  ;;  %935 = vmatpush1.bf16.msra.mxu1 %v1365_v35  ;;  %v1457_v34 = vld [vmem:[#allocation5 + $0x2ec] ss:$16 sps:$4 sm:$0xff]   ;;  %v1452_v35 = vld [vmem:[#allocation5 + $0x2e0] ss:$16 sps:$4 sm:$0xff]  }
  0x59   :  { %854 = vmatprep.subr.bf16.mxu0 %v1366_v36  ;;  %936 = vmatprep.subr.bf16.mxu1 %v1368_v37  ;;  %v1455_v36 = vld [vmem:[#allocation5 + $0x2e8] ss:$16 sps:$4 sm:$0xff]   ;;  %v1460_v37 = vld [vmem:[#allocation5 + $0x304] ss:$16 sps:$4 sm:$0xff]   ;;  %p1589_p13 = por %p1588_p12, %p1587_p11 }
  0x5b   :  { %p1590_p0 = pnand %p1589_p13, %p1583_p10 }
  0x5c   :  { %855 = vmatpush1.bf16.msra.mxu0 %v1370_v38  ;;  %937 = vmatpush1.bf16.msra.mxu1 %v1371_v39  ;;  %v1463_v38 = vld [vmem:[#allocation5 + $0x30c] ss:$16 sps:$4 sm:$0xff]   ;;  %v1458_v39 = vld [vmem:[#allocation5 + $0x300] ss:$16 sps:$4 sm:$0xff]  }
  0x5d   :  { %856 = vmatprep.subr.bf16.mxu0 %v1372_v40  ;;  %938 = vmatprep.subr.bf16.mxu1 %v1374_v41  ;;  %v1461_v40 = vld [vmem:[#allocation5 + $0x308] ss:$16 sps:$4 sm:$0xff]   ;;  %v1466_v41 = vld [vmem:[#allocation5 + $0x324] ss:$16 sps:$4 sm:$0xff]  }
  0x60   :  { %857 = vmatpush1.bf16.msra.mxu0 %v1376_v42  ;;  %939 = vmatpush1.bf16.msra.mxu1 %v1377_v43  ;;  %v1469_v42 = vld [vmem:[#allocation5 + $0x32c] ss:$16 sps:$4 sm:$0xff]   ;;  %v1464_v43 = vld [vmem:[#allocation5 + $0x320] ss:$16 sps:$4 sm:$0xff]  }
  0x61   :  { %858 = vmatprep.subr.bf16.mxu0 %v1378_v44  ;;  %940 = vmatprep.subr.bf16.mxu1 %v1380_v45  ;;  %v1467_v44 = vld [vmem:[#allocation5 + $0x328] ss:$16 sps:$4 sm:$0xff]   ;;  %v1472_v45 = vld [vmem:[#allocation5 + $0x344] ss:$16 sps:$4 sm:$0xff]  }
  0x64   :  { %859 = vmatpush1.bf16.msra.mxu0 %v1382_v47  ;;  %941 = vmatpush1.bf16.msra.mxu1 %v1383_v49  ;;  %v1470_v47 = vld [vmem:[#allocation5 + $0x340] ss:$16 sps:$4 sm:$0xff]   ;;  %v1478_v49 = vld [vmem:[#allocation5 + $0x364] ss:$16 sps:$4 sm:$0xff]  }
  0x65   :  { %860 = vmatprep.subr.bf16.mxu0 %v1384_v50  ;;  %942 = vmatprep.subr.bf16.mxu1 %v1386_v51  ;;  %v1481_v50 = vld [vmem:[#allocation5 + $0x36c] ss:$16 sps:$4 sm:$0xff]   ;;  %v1476_v51 = vld [vmem:[#allocation5 + $0x360] ss:$16 sps:$4 sm:$0xff]  }
  0x68   :  { %861 = vmatpush1.bf16.msra.mxu0 %v1388_v52  ;;  %943 = vmatpush1.bf16.msra.mxu1 %v1389_v53  ;;  %v1479_v52 = vld [vmem:[#allocation5 + $0x368] ss:$16 sps:$4 sm:$0xff]   ;;  %v1484_v53 = vld [vmem:[#allocation5 + $0x384] ss:$16 sps:$4 sm:$0xff]  }
  0x69   :  { %862 = vmatprep.subr.bf16.mxu0 %v1390_v54  ;;  %944 = vmatprep.subr.bf16.mxu1 %v1392_v55  ;;  %v1487_v54 = vld [vmem:[#allocation5 + $0x38c] ss:$16 sps:$4 sm:$0xff]   ;;  %v1482_v55 = vld [vmem:[#allocation5 + $0x380] ss:$16 sps:$4 sm:$0xff]  }
  0x6c   :  { %863 = vmatpush1.bf16.msra.mxu0 %v1394_v56  ;;  %945 = vmatpush1.bf16.msra.mxu1 %v1395_v57  ;;  %v1485_v56 = vld [vmem:[#allocation5 + $0x388] ss:$16 sps:$4 sm:$0xff]   ;;  %v1490_v57 = vld [vmem:[#allocation5 + $0x3a4] ss:$16 sps:$4 sm:$0xff]  }
  0x6d   :  { %864 = vmatprep.subr.bf16.mxu0 %v1396_v58  ;;  %946 = vmatprep.subr.bf16.mxu1 %v1398_v59  ;;  %v1493_v58 = vld [vmem:[#allocation5 + $0x3ac] ss:$16 sps:$4 sm:$0xff]   ;;  %v1488_v59 = vld [vmem:[#allocation5 + $0x3a0] ss:$16 sps:$4 sm:$0xff]  }
  0x70   :  { %865 = vmatpush1.bf16.msra.mxu0 %v1400_v60  ;;  %947 = vmatpush1.bf16.msra.mxu1 %v1401_v61  ;;  %v1491_v60 = vld [vmem:[#allocation5 + $0x3a8] ss:$16 sps:$4 sm:$0xff]   ;;  %v1496_v61 = vld [vmem:[#allocation5 + $0x3c4] ss:$16 sps:$4 sm:$0xff]  }
  0x71   :  { %866 = vmatprep.subr.bf16.mxu0 %v1402_v62  ;;  %948 = vmatprep.subr.bf16.mxu1 %v1404_v63  ;;  %v1499_v62 = vld [vmem:[#allocation5 + $0x3cc] ss:$16 sps:$4 sm:$0xff]   ;;  %v1494_v63 = vld [vmem:[#allocation5 + $0x3c0] ss:$16 sps:$4 sm:$0xff]  }
  0x74   :  { %867 = vmatpush1.bf16.msra.mxu0 %v1406_v0  ;;  %949 = vmatpush1.bf16.msra.mxu1 %v1407_v1  ;;  %v1497_v0 = vld [vmem:[#allocation5 + $0x3c8] ss:$16 sps:$4 sm:$0xff]   ;;  %v1502_v1 = vld [vmem:[#allocation5 + $0x3e4] ss:$16 sps:$4 sm:$0xff]  }
  0x75   :  { %877 = vmatprep.subr.bf16.mxu0 %v1412_v2  ;;  %959 = vmatprep.subr.bf16.mxu1 %v1415_v3  ;;  %v1505_v2 = vld [vmem:[#allocation5 + $0x3ec] ss:$16 sps:$4 sm:$0xff]   ;;  %v1500_v3 = vld [vmem:[#allocation5 + $0x3e0] ss:$16 sps:$4 sm:$0xff]  }
  0x77   :  { %869 = vmatmul.mubr.bf16.vlgmr.msra.gmra.mrb[0].mxu0 %v1166_v4  ;;  %951 = vmatmul.mubr.bf16.vlgmr.msra.gmra.mrb[0].mxu1 %v1166_v4  ;;  %v1503_v4 = vld [vmem:[#allocation5 + $0x3e8] ss:$16 sps:$4 sm:$0xff]  }
  0x78   :  { %878 = vmatpush1.bf16.msra.mxu0 %v1410_v5  ;;  %960 = vmatpush1.bf16.msra.mxu1 %v1413_v6  ;;  %v1168_v5 = vcombine.low %v1672_v29, %v1672_v29 }
  0x79   :  { %879 = vmatprep.subr.bf16.mxu0 %v1418_v7  ;;  %961 = vmatprep.subr.bf16.mxu1 %v1421_v8 }
  0x7a   :  { %909 = vmatprep.mubr.bf16.mxu0 %v1169_v30  ;;  %991 = vmatprep.mubr.bf16.mxu1 %v1169_v30 }
  0x7c   :  { %880 = vmatpush1.bf16.msra.mxu0 %v1416_v9  ;;  %962 = vmatpush1.bf16.msra.mxu1 %v1419_v10 }
  0x7d   :  { %881 = vmatprep.subr.bf16.mxu0 %v1424_v11  ;;  %963 = vmatprep.subr.bf16.mxu1 %v1427_v12 }
  0x80   :  { %882 = vmatpush1.bf16.msra.mxu0 %v1422_v13  ;;  %964 = vmatpush1.bf16.msra.mxu1 %v1425_v14 }
  0x81   :  { %883 = vmatprep.subr.bf16.mxu0 %v1430_v15  ;;  %965 = vmatprep.subr.bf16.mxu1 %v1433_v16 }
  0x84   :  { %884 = vmatpush1.bf16.msra.mxu0 %v1428_v17  ;;  %966 = vmatpush1.bf16.msra.mxu1 %v1431_v18 }
  0x85   :  { %885 = vmatprep.subr.bf16.mxu0 %v1436_v19  ;;  %967 = vmatprep.subr.bf16.mxu1 %v1439_v20 }
  0x88   :  { %886 = vmatpush1.bf16.msra.mxu0 %v1434_v21  ;;  %968 = vmatpush1.bf16.msra.mxu1 %v1437_v22 }
  0x89   :  { %887 = vmatprep.subr.bf16.mxu0 %v1442_v23  ;;  %969 = vmatprep.subr.bf16.mxu1 %v1445_v24 }
  0x8c   :  { %888 = vmatpush1.bf16.msra.mxu0 %v1440_v25  ;;  %970 = vmatpush1.bf16.msra.mxu1 %v1443_v26 }
  0x8d   :  { %889 = vmatprep.subr.bf16.mxu0 %v1448_v27  ;;  %971 = vmatprep.subr.bf16.mxu1 %v1451_v28 }
  0x90   :  { %890 = vmatpush1.bf16.msra.mxu0 %v1446_v31  ;;  %972 = vmatpush1.bf16.msra.mxu1 %v1449_v32 }
  0x91   :  { %891 = vmatprep.subr.bf16.mxu0 %v1454_v33  ;;  %973 = vmatprep.subr.bf16.mxu1 %v1457_v34 }
  0x94   :  { %892 = vmatpush1.bf16.msra.mxu0 %v1452_v35  ;;  %974 = vmatpush1.bf16.msra.mxu1 %v1455_v36 }
  0x95   :  { %893 = vmatprep.subr.bf16.mxu0 %v1460_v37  ;;  %975 = vmatprep.subr.bf16.mxu1 %v1463_v38 }
  0x98   :  { %894 = vmatpush1.bf16.msra.mxu0 %v1458_v39  ;;  %976 = vmatpush1.bf16.msra.mxu1 %v1461_v40 }
  0x99   :  { %895 = vmatprep.subr.bf16.mxu0 %v1466_v41  ;;  %977 = vmatprep.subr.bf16.mxu1 %v1469_v42 }
  0x9c   :  { %896 = vmatpush1.bf16.msra.mxu0 %v1464_v43  ;;  %978 = vmatpush1.bf16.msra.mxu1 %v1467_v44 }
  0x9d   :  { %897 = vmatprep.subr.bf16.mxu0 %v1472_v45  ;;  %979 = vmatprep.subr.bf16.mxu1 %v1475_v46 }
  0xa0   :  { %898 = vmatpush1.bf16.msra.mxu0 %v1470_v47  ;;  %980 = vmatpush1.bf16.msra.mxu1 %v1473_v48 }
  0xa1   :  { %899 = vmatprep.subr.bf16.mxu0 %v1478_v49  ;;  %981 = vmatprep.subr.bf16.mxu1 %v1481_v50 }
  0xa4   :  { %900 = vmatpush1.bf16.msra.mxu0 %v1476_v51  ;;  %982 = vmatpush1.bf16.msra.mxu1 %v1479_v52 }
  0xa5   :  { %901 = vmatprep.subr.bf16.mxu0 %v1484_v53  ;;  %983 = vmatprep.subr.bf16.mxu1 %v1487_v54 }
  0xa8   :  { %902 = vmatpush1.bf16.msra.mxu0 %v1482_v55  ;;  %984 = vmatpush1.bf16.msra.mxu1 %v1485_v56 }
  0xa9   :  { %903 = vmatprep.subr.bf16.mxu0 %v1490_v57  ;;  %985 = vmatprep.subr.bf16.mxu1 %v1493_v58 }
  0xac   :  { %904 = vmatpush1.bf16.msra.mxu0 %v1488_v59  ;;  %986 = vmatpush1.bf16.msra.mxu1 %v1491_v60 }
  0xad   :  { %905 = vmatprep.subr.bf16.mxu0 %v1496_v61  ;;  %987 = vmatprep.subr.bf16.mxu1 %v1499_v62 }
  0xb0   :  { %906 = vmatpush1.bf16.msra.mxu0 %v1494_v63  ;;  %988 = vmatpush1.bf16.msra.mxu1 %v1497_v0 }
  0xb1   :  { %907 = vmatprep.subr.bf16.mxu0 %v1502_v1  ;;  %989 = vmatprep.subr.bf16.mxu1 %v1505_v2 }
  0xb4   :  { %908 = vmatpush1.bf16.msra.mxu0 %v1500_v3  ;;  %990 = vmatpush1.bf16.msra.mxu1 %v1503_v4 }
  0xb7   :  { %910 = vmatmul.mubr.bf16.vlgmr.msra.gmra.mrb[0].mxu0 %v1168_v5  ;;  %992 = vmatmul.mubr.bf16.vlgmr.msra.gmra.mrb[0].mxu1 %v1168_v5 }
 0x18a   :  { %v911_v6 = vpop.f32.mrb[0].mxu0  ;;  %v993_v7 = vpop.f32.mrb[0].mxu1 }
 0x18b   :  { %v1000_v8 = vrot.slane %v911_v6, 4  ;;  %v1012_v9 = vrot.slane %v993_v7, 4  ;;  %v913_v10 = vpop.f32.mrb[1].mxu0  ;;  %v995_v11 = vpop.f32.mrb[1].mxu1 }
 0x18c   :  { %v1006_v12 = vrot.slane %v913_v10, 4  ;;  %v1018_v13 = vrot.slane %v995_v11, 4  ;;  %v915_v14 = vpop.f32.mrb[2].mxu0  ;;  %v997_v15 = vpop.f32.mrb[2].mxu1 }
 0x18d   :  { %v1001_v16 = vadd.f32 %v1000_v8, %v911_v6  ;;  %v1013_v17 = vadd.f32 %v1012_v9, %v993_v7  ;;  %v916_v18 = vpop.f32.mrb[3].mxu0  ;;  %v998_v19 = vpop.f32.mrb[3].mxu1  ;;  %v1075_v8 = vlaneseq }
 0x18e   :  { %v1007_v20 = vadd.f32 %v1006_v12, %v913_v10  ;;  %v1019_v21 = vadd.f32 %v1018_v13, %v995_v11 }
 0x18f   :  { %v1002_v22 = vrot.slane %v1001_v16, 2  ;;  %v1014_v23 = vrot.slane %v1013_v17, 2 }
 0x190   :  { %v1008_v24 = vrot.slane %v1007_v20, 2  ;;  %v1020_v25 = vrot.slane %v1019_v21, 2 }
 0x191   :  { %v1003_v26 = vadd.f32 %v1002_v22, %v1001_v16  ;;  %v1015_v27 = vadd.f32 %v1014_v23, %v1013_v17  ;;  %v1076_v17 = vshrl.u32 %v1075_v8, 7 }
 0x192   :  { %v1009_v28 = vadd.f32 %v1008_v24, %v1007_v20  ;;  %v1021_v29 = vadd.f32 %v1020_v25, %v1019_v21  ;;  %v1073_v21 = vld [vmem:[#allocation7] ss:$2 sm:$0xf] }
 0x193   :  { %v1004_v30 = vrot.slane %v1003_v26, 1  ;;  %v1016_v31 = vrot.slane %v1015_v27, 1  ;;  %v1077_v20 = vsub.s32 0, %v1076_v17  ;;  %v1085_v22 = vsub.s32 2, %v1076_v17 }
 0x194   :  { %v1010_v32 = vrot.slane %v1009_v28, 1  ;;  %v1022_v33 = vrot.slane %v1021_v29, 1  ;;  %v1081_v23 = vsub.s32 1, %v1076_v17  ;;  %v1089_v24 = vsub.s32 3, %v1076_v17 }
 0x195   :  { %v1005_v34 = vadd.f32 %v1004_v30, %v1003_v26  ;;  %v1017_v35 = vadd.f32 %v1016_v31, %v1015_v27  ;;  %v1078_v25 = vrot.slane %v1073_v21, %v1077_v20  ;;  %v1086_v26 = vrot.slane %v1073_v21, %v1085_v22 }
 0x196   :  { %v1011_v36 = vadd.f32 %v1010_v32, %v1009_v28  ;;  %v1023_v37 = vadd.f32 %v1022_v33, %v1021_v29  ;;  %v1082_v27 = vrot.slane %v1073_v21, %v1081_v23  ;;  %v1120_v29 = vld [vmem:[#allocation7 + $0x1] ss:$2 sm:$0xf]  ;;  %v1090_v30 = vrot.slane %v1073_v21, %v1089_v24 }
 0x197   :  { %v1025_v38 = vmul.f32 0.125, %v1005_v34  ;;  %v1027_v39 = vmul.f32 0.125, %v1017_v35 }
 0x198   :  { %v1026_v40 = vmul.f32 0.125, %v1011_v36  ;;  %v1028_v41 = vmul.f32 0.125, %v1023_v37  ;;  %v1125_v37 = vrot.slane %v1120_v29, %v1077_v20 }
 0x199   :  { %v1678_v42 = vsub.f32 %v911_v6, %v1025_v38  ;;  %v1680_v43 = vsub.f32 %v993_v7, %v1027_v39 }
 0x19a   :  { %v1682_v44 = vsub.f32 %v913_v10, %v1026_v40  ;;  %v1684_v45 = vsub.f32 %v995_v11, %v1028_v41  ;;  %v1133_v40 = vrot.slane %v1120_v29, %v1085_v22 }
 0x19b   :  { %v1033_v46 = vmul.f32 %v1678_v42, %v1678_v42  ;;  %v1035_v47 = vmul.f32 %v1680_v43, %v1680_v43 }
 0x19c   :  { %v1034_v48 = vmul.f32 %v1682_v44, %v1682_v44  ;;  %v1036_v49 = vmul.f32 %v1684_v45, %v1684_v45 }
 0x19d   :  { %v1037_v50 = vrot.slane %v1033_v46, 4  ;;  %v1049_v51 = vrot.slane %v1035_v47, 4 }
 0x19e   :  { %v1043_v52 = vrot.slane %v1034_v48, 4  ;;  %v1055_v53 = vrot.slane %v1036_v49, 4 }
 0x19f   :  { %v1038_v54 = vadd.f32 %v1037_v50, %v1033_v46  ;;  %v1050_v55 = vadd.f32 %v1049_v51, %v1035_v47  ;;  %v1137_v51 = vrot.slane %v1120_v29, %v1089_v24 }
 0x1a0   :  { %v1044_v56 = vadd.f32 %v1043_v52, %v1034_v48  ;;  %v1056_v57 = vadd.f32 %v1055_v53, %v1036_v49  ;;  %v1129_v48 = vrot.slane %v1120_v29, %v1081_v23 }
 0x1a1   :  { %v1039_v58 = vrot.slane %v1038_v54, 2  ;;  %v1051_v59 = vrot.slane %v1050_v55, 2 }
 0x1a2   :  { %v1045_v60 = vrot.slane %v1044_v56, 2  ;;  %v1057_v61 = vrot.slane %v1056_v57, 2 }
 0x1a3   :  { %v1040_v62 = vadd.f32 %v1039_v58, %v1038_v54  ;;  %v1052_v63 = vadd.f32 %v1051_v59, %v1050_v55 }
 0x1a4   :  { %v1046_v0 = vadd.f32 %v1045_v60, %v1044_v56  ;;  %v1058_v1 = vadd.f32 %v1057_v61, %v1056_v57 }
 0x1a5   :  { %v1041_v2 = vrot.slane %v1040_v62, 1  ;;  %v1053_v3 = vrot.slane %v1052_v63, 1 }
 0x1a6   :  { %v1047_v4 = vrot.slane %v1046_v0, 1  ;;  %v1059_v5 = vrot.slane %v1058_v1, 1 }
 0x1a7   :  { %v1042_v6 = vadd.f32 %v1041_v2, %v1040_v62  ;;  %v1054_v7 = vadd.f32 %v1053_v3, %v1052_v63 }
 0x1a8   :  { %v1048_v9 = vadd.f32 %v1047_v4, %v1046_v0  ;;  %v1060_v10 = vadd.f32 %v1059_v5, %v1058_v1 }
 0x1a9   :  { %v1061_v11 = vmul.f32 0.125, %v1042_v6  ;;  %v1063_v12 = vmul.f32 0.125, %v1054_v7 }
 0x1aa   :  { %v1062_v13 = vmul.f32 0.125, %v1048_v9  ;;  %v1064_v14 = vmul.f32 0.125, %v1060_v10 }
 0x1ab   :  { %v1065_v15 = vadd.f32 1e-05, %v1061_v11  ;;  %v1067_v16 = vadd.f32 1e-05, %v1063_v12 }
 0x1ac   :  { %v1066_v18 = vadd.f32 1e-05, %v1062_v13  ;;  %v1068_v19 = vadd.f32 1e-05, %v1064_v14 }
 0x1ad   :  { %1508 = vrsqrt.f32 %v1065_v15 }
 0x1ae   :  { %1510 = vrsqrt.f32 %v1067_v16 }
 0x1af   :  { %1512 = vrsqrt.f32 %v1066_v18 }
 0x1b0   :  { %1514 = vrsqrt.f32 %v1068_v19 }
 0x1b7   :  { %v1509_v28 = vpop.eup %1508 }
 0x1b8   :  { %v1511_v31 = vpop.eup %1510  ;;  %v1095_v32 = vmul.f32 %v1509_v28, %v1078_v25 }
 0x1b9   :  { %v1513_v33 = vpop.eup %1512  ;;  %v1097_v34 = vmul.f32 %v1511_v31, %v1086_v26 }
 0x1ba   :  { %v1515_v35 = vpop.eup %1514  ;;  %v1102_v36 = vrot.slane %v1095_v32, %v1077_v20  ;;  %v1096_v38 = vmul.f32 %v1513_v33, %v1082_v27 }
 0x1bb   :  { %v1110_v39 = vrot.slane %v1097_v34, %v1077_v20  ;;  %v1098_v41 = vmul.f32 %v1515_v35, %v1090_v30 }
 0x1bc   :  { %v1115_v46 = vmul.f32 %v1102_v36, %v1678_v42  ;;  %v1106_v47 = vrot.slane %v1096_v38, %v1077_v20 }
 0x1bd   :  { %v1117_v49 = vmul.f32 %v1110_v39, %v1680_v43  ;;  %v1114_v50 = vrot.slane %v1098_v41, %v1077_v20 }
 0x1be   :  { %v1142_v52 = vadd.f32 %v1125_v37, %v1115_v46  ;;  %v1116_v53 = vmul.f32 %v1106_v47, %v1682_v44 }
 0x1bf   :  { %v1144_v54 = vadd.f32 %v1133_v40, %v1117_v49  ;;  %v1118_v55 = vmul.f32 %v1114_v50, %v1684_v45 }
 0x1c0   :  { %1146 = vst [vmem:[#allocation8] sm:$0xff] %v1142_v52  ;;  %v1143_v56 = vadd.f32 %v1129_v48, %v1116_v53 }
 0x1c1   :  { %1148 = vst [vmem:[#allocation8 + $0x10] sm:$0xff] %v1144_v54  ;;  %v1145_v57 = vadd.f32 %v1137_v51, %v1118_v55 }
 0x1c2   :  { %1147 = vst [vmem:[#allocation8 + $0x8] sm:$0xff] %v1143_v56 }
 0x1c3   :  { %1149 = vst [vmem:[#allocation8 + $0x18] sm:$0xff] %v1145_v57 }
 0x1c4   :  { %1593 = shalt.err (!%p1590_p0)
}
 0x1c5   :  { %s1594_s25 = scalar_lea.hbm %s1713_s3, 512 }
 0x1c6   :  { %p1595_p1 = scmp.ne.s32.totalorder %s1713_s3, %s1594_s25  ;;  %p1598_p2 = scmp.lt.u32.totalorder %s1594_s25, %s1713_s3 }
 0x1c8   :  { %p1600_p3 = pnand %p1598_p2, %p1595_p1 }
 0x1ca   :  { %1603 = shalt.err (!%p1600_p3)
}
 0x1cb   :  { %1159 = dma.vmem_to_hbm [thread:$0]  %s1157_s21, 512, %s1713_s3, [#allocation4]  }
 0x1cc   :  { %1608 = dma.done.wait [#allocation4], 512  }
 0x1cd   :  { %1609 = vsyncadd [#allocation4], 4294966784 }
 0x1ce   :  { %1163 = vsyncpa [#allocation3], 1 }
 0x1cf   :  { %1164 = vsyncpa [#allocation6], 1 }
 0x1d0   :  { %1165 = vsyncpa [#allocation4], 1 }

</bundles_post_ra>
